<compile_context>
chip_gen: v7x
topology: tpu7x:2x2x1
jax: 0.10.0
libtpu: 0.0.40
codegen_flags: <defaults>
</compile_context>

<pallas_src>
import functools

import jax
import jax.numpy as jnp
from jax.experimental import pallas as pl
from jax.experimental.pallas import tpu as pltpu


def _prompt_kernel(x_ref, prompt_ref, out_ref, *, l_pad, r_pad, in_size):
    """Single-pass, band-structured write of one batch tile.

    x_ref:      (B, 3, in, in)   unpadded input tile
    prompt_ref: (3, H, W)        precomputed sigmoid(program) (batch-invariant)
    out_ref:    (B, 3, H, W)
    """
    b = out_ref.shape[0]
    H, W = out_ref.shape[2], out_ref.shape[3]
    top = l_pad
    bot = l_pad + in_size

    # ---- Top border band: pure prompt rows (full-width, lane-aligned). ----
    if top > 0:
        out_ref[:, :, :top, :] = jnp.broadcast_to(
            prompt_ref[:, :top, :][None], (b, 3, top, W))

    # ---- Bottom border band: pure prompt rows. ----
    if bot < H:
        out_ref[:, :, bot:, :] = jnp.broadcast_to(
            prompt_ref[:, bot:, :][None], (b, 3, H - bot, W))

    # ---- Middle band: composed once, stored full-width (no masked vst). ----
    x_clip = jnp.clip(x_ref[...], 0.0, 1.0)                       # (B,3,in,in)
    if l_pad == 0 and r_pad == 0:
        out_ref[...] = x_clip
        return

    # Place x at lane offset l_pad by zero-extending to width W. The lane
    # placement cost is paid once per tile here instead of as per-row shifted,
    # masked stores into out_ref.
    parts = []
    if l_pad > 0:
        parts.append(jnp.zeros((b, 3, in_size, l_pad), x_clip.dtype))
    parts.append(x_clip)
    if r_pad > 0:
        parts.append(jnp.zeros((b, 3, in_size, r_pad), x_clip.dtype))
    x_ext = jnp.concatenate(parts, axis=-1)                       # (B,3,in,W)

    # Interior-column mask, hoisted once and broadcast over the tile.
    col = jax.lax.broadcasted_iota(jnp.int32, (1, 1, 1, W), 3)
    col_in = jnp.logical_and(col >= l_pad, col < l_pad + in_size)

    mid = jnp.where(col_in, x_ext, prompt_ref[:, top:bot, :][None])
    out_ref[:, :, top:bot, :] = mid


def _vmem_capacity_bytes():
    """Physical VMEM per TensorCore (conservative fallback if unqueryable)."""
    try:
        info = pltpu.get_tpu_info()
        cap = getattr(info, "vmem_capacity_bytes", None)
        if cap:
            return int(cap)
    except Exception:
        pass
    return 64 << 20  # v7x per-TC size; safe lower bound for v5e/v6e too.


def _pick_batch_tile(n, input_size, H, W, phys_vmem):
    """Per-step batch tile under a generation-aware VMEM budget.

    Accounts for double-buffered x/out tiles, the resident prompt buffers and
    roughly one tile of in-kernel intermediates (x_ext / composed middle
    band). Keeps the grid at >= 2 steps (when n >= 2) so the parallel batch
    axis can shard across TensorCores and prefetch/writeback overlap exists.
    Returns (batch_tile, estimated_resident_bytes).
    """
    # ~3 copies of each of x and out per image: 2 pipeline buffers + 1
    # intermediate (conservative).
    bytes_per_img = 4 * 3 * (3 * input_size * input_size + 3 * H * W)
    fixed = 2 * 4 * 3 * H * W  # double-buffered prompt operand
    budget = min(phys_vmem // 3, 24 << 20)
    bt = max(1, (budget - fixed) // bytes_per_img)
    bt = min(bt, max(1, -(-n // 2)))   # keep >= 2 grid steps when n >= 2
    bt = min(bt, n)
    return int(bt), int(bytes_per_img * bt + fixed)


def expansive_visual_prompt(x, program, input_size, output_size):
    """x: (N, 3, input_size, input_size) float32 in [0, 1].
    program: (3, output_size, output_size) float32 parameter.
    Returns (N, 3, output_size, output_size) float32."""
    n, c, h, w = x.shape
    assert c == 3 and h == input_size and w == input_size
    assert output_size >= input_size, "output_size must be >= input_size"
    H = W = output_size
    l_pad = (output_size - input_size + 1) // 2
    r_pad = (output_size - input_size) // 2

    # Hoisted out of the per-batch grid: one EUP pass total, no mask array.
    prompt = jax.nn.sigmoid(program).astype(jnp.float32)          # (3, H, W)

    phys_vmem = _vmem_capacity_bytes()
    b_tile, resident_bytes = _pick_batch_tile(n, input_size, H, W, phys_vmem)
    grid = (pl.cdiv(n, b_tile),)   # partial last batch block is fine

    vmem_limit = max(resident_bytes + (4 << 20), 32 << 20)
    vmem_limit = min(vmem_limit, phys_vmem * 3 // 4)

    kernel = functools.partial(
        _prompt_kernel, l_pad=l_pad, r_pad=r_pad, in_size=input_size)

    bytes_accessed = 4 * (n * 3 * input_size * input_size   # read x
                          + 3 * H * W                        # read prompt once
                          + n * 3 * H * W)                   # write out
    cost = pl.CostEstimate(
        flops=4 * n * 3 * H * W,     # clip + select, purely memory-bound
        transcendentals=0,           # sigmoid hoisted to the wrapper
        bytes_accessed=bytes_accessed,
    )

    out = pl.pallas_call(
        kernel,
        out_shape=jax.ShapeDtypeStruct((n, 3, H, W), jnp.float32),
        grid_spec=pltpu.PrefetchScalarGridSpec(
            num_scalar_prefetch=0,
            grid=grid,
            in_specs=[
                # Unpadded x: the zero-pad is fused into the kernel.
                pl.BlockSpec((b_tile, 3, input_size, input_size),
                             lambda b: (b, 0, 0, 0)),
                # Batch-invariant prompt plane; constant block index, so the
                # pipeline does not re-DMA it across grid steps.
                pl.BlockSpec((3, H, W), lambda b: (0, 0, 0)),
            ],
            out_specs=pl.BlockSpec((b_tile, 3, H, W), lambda b: (b, 0, 0, 0)),
        ),
        compiler_params=pltpu.CompilerParams(
            dimension_semantics=("parallel",),
            vmem_limit_bytes=vmem_limit,
        ),
        cost_estimate=cost,
    )(x, prompt)
    return out
    # TODO(synk): optional torchvision `normalize` (None in the reference
    # module config) is not implemented.


def _reference(x, program, input_size, output_size):
    l_pad = (output_size - input_size + 1) // 2
    r_pad = (output_size - input_size) // 2
    x_pad = jnp.pad(
        x, ((0, 0), (0, 0), (l_pad, r_pad), (l_pad, r_pad)), constant_values=0.0
    )
    mask = jnp.pad(
        jnp.zeros((3, input_size, input_size), jnp.float32),
        ((0, 0), (l_pad, r_pad), (l_pad, r_pad)),
        constant_values=1.0,
    )
    return jnp.clip(x_pad + jax.nn.sigmoid(program) * mask, 0.0, 1.0)


if __name__ == "__main__":
    key = jax.random.PRNGKey(0)
    k1, k2 = jax.random.split(key)

    batch = 2
    input_size = 16
    output_size = 32

    # Deterministic synthetic inputs / parameters. The module __init__ uses a
    # zeros parameter; a small deterministic random init exercises the
    # sigmoid/prompt path non-trivially (forward semantics unchanged).
    x = jax.random.uniform(k1, (batch, 3, input_size, input_size), jnp.float32)
    program = 0.1 * jax.random.normal(
        k2, (3, output_size, output_size), jnp.float32)

    out = expansive_visual_prompt(x, program, input_size, output_size)
    out = jax.block_until_ready(out)

    ref = _reference(x, program, input_size, output_size)
    assert out.shape == (batch, 3, output_size, output_size)
    assert jnp.allclose(out, ref, atol=1e-6, rtol=1e-6)

    print("KERNEL_OK")
</pallas_src>

<mosaic_0001>
module attributes {stable_mosaic.version = 11 : i64} {
  func.func @_prompt_kernel(%arg0: i32, %arg1: memref<1x3x16x16xf32, #tpu.memory_space<vmem>>, %arg2: memref<3x32x32xf32, #tpu.memory_space<vmem>>, %arg3: memref<1x3x32x32xf32, #tpu.memory_space<vmem>>) attributes {dimension_semantics = [#tpu.dimension_semantics<parallel>], iteration_bounds = array<i64: 2>, scalar_prefetch = 0 : i64, scratch_operands = 0 : i64, tpu.core_type = #tpu.core_type<tc>, window_params = [{transform_indices = @transform_0, window_bounds = array<i64: 1, 3, 16, 16>}, {pipeline_mode = #tpu.pipeline_mode<synchronous>, transform_indices = @transform_1, window_bounds = array<i64: 3, 32, 32>}, {transform_indices = @transform_2, window_bounds = array<i64: 1, 3, 32, 32>}]} {
    %c0 = arith.constant 0 : index
    %c0_0 = arith.constant 0 : index
    %c0_1 = arith.constant 0 : index
    %0 = vector.load %arg2[%c0, %c0_0, %c0_1] : memref<3x32x32xf32, #tpu.memory_space<vmem>>, vector<3x8x32xf32>
    %1 = vector.shape_cast %0 : vector<3x8x32xf32> to vector<1x3x8x32xf32>
    %c0_2 = arith.constant 0 : index
    %c0_3 = arith.constant 0 : index
    %c0_4 = arith.constant 0 : index
    %c0_5 = arith.constant 0 : index
    %2 = vector.load %arg3[%c0_2, %c0_3, %c0_4, %c0_5] : memref<1x3x32x32xf32, #tpu.memory_space<vmem>>, vector<1x3x8x32xf32>
    tpu.vector_store %arg3[%c0_2, %c0_3, %c0_4, %c0_5], %1 {strides = array<i32>} : memref<1x3x32x32xf32, #tpu.memory_space<vmem>>, vector<1x3x8x32xf32>,
    %c0_6 = arith.constant 0 : index
    %c24 = arith.constant 24 : index
    %c0_7 = arith.constant 0 : index
    %3 = vector.load %arg2[%c0_6, %c24, %c0_7] : memref<3x32x32xf32, #tpu.memory_space<vmem>>, vector<3x8x32xf32>
    %4 = vector.shape_cast %3 : vector<3x8x32xf32> to vector<1x3x8x32xf32>
    %c0_8 = arith.constant 0 : index
    %c0_9 = arith.constant 0 : index
    %c24_10 = arith.constant 24 : index
    %c0_11 = arith.constant 0 : index
    %5 = vector.load %arg3[%c0_8, %c0_9, %c24_10, %c0_11] : memref<1x3x32x32xf32, #tpu.memory_space<vmem>>, vector<1x3x8x32xf32>
    tpu.vector_store %arg3[%c0_8, %c0_9, %c24_10, %c0_11], %4 {strides = array<i32>} : memref<1x3x32x32xf32, #tpu.memory_space<vmem>>, vector<1x3x8x32xf32>,
    %c0_12 = arith.constant 0 : index
    %c0_13 = arith.constant 0 : index
    %c0_14 = arith.constant 0 : index
    %c0_15 = arith.constant 0 : index
    %6 = vector.load %arg1[%c0_12, %c0_13, %c0_14, %c0_15] : memref<1x3x16x16xf32, #tpu.memory_space<vmem>>, vector<1x3x16x16xf32>
    %cst = arith.constant 0.000000e+00 : f32
    %cst_16 = arith.constant 1.000000e+00 : f32
    %7 = vector.broadcast %cst : f32 to vector<1x3x16x16xf32>
    %8 = arith.maximumf %7, %6 : vector<1x3x16x16xf32>
    %9 = vector.broadcast %cst_16 : f32 to vector<1x3x16x16xf32>
    %10 = arith.minimumf %9, %8 : vector<1x3x16x16xf32>
    %cst_17 = arith.constant 0.000000e+00 : f32
    %11 = vector.broadcast %cst_17 : f32 to vector<1x3x16x8xf32>
    %cst_18 = arith.constant 0.000000e+00 : f32
    %12 = vector.broadcast %cst_18 : f32 to vector<1x3x16x8xf32>
    %13 = tpu.concatenate %11, %10, %12 in 3 : vector<1x3x16x8xf32>, vector<1x3x16x16xf32>, vector<1x3x16x8xf32> -> vector<1x3x16x32xf32>
    %14 = tpu.iota {dimensions = array<i32: 3>} : vector<1x1x1x32xi32>
    %c8_i32 = arith.constant 8 : i32
    %15 = vector.broadcast %c8_i32 : i32 to vector<1x1x1x32xi32>
    %16 = arith.cmpi sge, %14, %15 : vector<1x1x1x32xi32>
    %c24_i32 = arith.constant 24 : i32
    %17 = vector.broadcast %c24_i32 : i32 to vector<1x1x1x32xi32>
    %18 = arith.cmpi slt, %14, %17 : vector<1x1x1x32xi32>
    %19 = arith.andi %16, %18 : vector<1x1x1x32xi1>
    %c0_19 = arith.constant 0 : index
    %c8 = arith.constant 8 : index
    %c0_20 = arith.constant 0 : index
    %20 = vector.load %arg2[%c0_19, %c8, %c0_20] : memref<3x32x32xf32, #tpu.memory_space<vmem>>, vector<3x16x32xf32>
    %21 = vector.shape_cast %20 : vector<3x16x32xf32> to vector<1x3x16x32xf32>
    %22 = vector.shape_cast %19 : vector<1x1x1x32xi1> to vector<1x1x1x32xi1>
    %23 = vector.broadcast %22 : vector<1x1x1x32xi1> to vector<1x3x16x32xi1>
    %24 = arith.select %23, %13, %21 : vector<1x3x16x32xi1>, vector<1x3x16x32xf32>
    %c0_21 = arith.constant 0 : index
    %c0_22 = arith.constant 0 : index
    %c8_23 = arith.constant 8 : index
    %c0_24 = arith.constant 0 : index
    %25 = vector.load %arg3[%c0_21, %c0_22, %c8_23, %c0_24] : memref<1x3x32x32xf32, #tpu.memory_space<vmem>>, vector<1x3x16x32xf32>
    tpu.vector_store %arg3[%c0_21, %c0_22, %c8_23, %c0_24], %24 {strides = array<i32>} : memref<1x3x32x32xf32, #tpu.memory_space<vmem>>, vector<1x3x16x32xf32>,
    return
  }
  func.func @transform_0(%arg0: i32) -> (i32, i32, i32, i32) {
    %c0_i32 = arith.constant 0 : i32
    %c0_i32_0 = arith.constant 0 : i32
    %c0_i32_1 = arith.constant 0 : i32
    %c0_i32_2 = arith.constant 0 : i32
    return %arg0, %c0_i32, %c0_i32_0, %c0_i32_1 : i32, i32, i32, i32
  }
  func.func @transform_1(%arg0: i32) -> (i32, i32, i32) {
    %c0_i32 = arith.constant 0 : i32
    %c0_i32_0 = arith.constant 0 : i32
    %c0_i32_1 = arith.constant 0 : i32
    %c0_i32_2 = arith.constant 0 : i32
    return %c0_i32, %c0_i32_0, %c0_i32_1 : i32, i32, i32
  }
  func.func @transform_2(%arg0: i32) -> (i32, i32, i32, i32) {
    %c0_i32 = arith.constant 0 : i32
    %c0_i32_0 = arith.constant 0 : i32
    %c0_i32_1 = arith.constant 0 : i32
    %c0_i32_2 = arith.constant 0 : i32
    return %arg0, %c0_i32, %c0_i32_0, %c0_i32_1 : i32, i32, i32, i32
  }
}

</mosaic_0001>

<bundles_post_ra>
// kernel: tpu_custom_call.1
= control target key start
LH: loop header
LB: loop body
LE: loop exit
PB: predicated region body
PF: predicated region fallthrough
CT: control target
= control target key end

     0   :  { %7 = vsyncpa [#allocation3], 0  ;;  %s866_s0 = inlined_call_operand.hbm [shape: f32[2,3,16,16], index: 0, kind: input, shape index: {}]   ;;  %s867_s1 = inlined_call_operand.hbm [shape: f32[3,32,32], index: 1, kind: input, shape index: {}]   ;;  %s868_s2 = inlined_call_operand.hbm [shape: f32[2,3,32,32], index: 2, kind: output, shape index: {}]  }
   0x1   :  { %9 = vsyncpa [#allocation3 + $0x1], 0 }
   0x2   :  { %10 = vsyncpa [#allocation6], 0 }
   0x3   :  { %11 = vsyncpa [#allocation4], 0 }
   0x4   :  { %13 = vsyncpa [#allocation4 + $0x1], 0  ;;  %s596_s9 = smov 0   ;;  %s598_s10 = smov 0  }
   0x5   :  { %s600_s11 = smov 0   ;;  %s602_s12 = smov 0  }
   0x6 LB: > { %s617_s13 = sadd.s32 4294967295, %s572_s12   ;;  %s368_s14 = sadd.s32 4294967294, %s572_s12   ;;  %s572_s12 = sphi %s602_s12, %s890_s12   ;;  %s568_s11 = sphi %s600_s11, %s889_s11   ;;  %s564_s10 = sphi %s598_s10, %s888_s10   ;;  %s560_s9 = sphi %s596_s9, %s887_s9  }
   0x7   : > { %p39_p0 = scmp.ne.s32.totalorder %s564_s10, %s560_s9  ;;  %p869_p1 = scmp.eq.s32.totalorder %s617_s13, 0 }
   0x8   : > { %p90_p3 = scmp.eq.s32.totalorder %s368_s14, 1  ;;  %p369_p5 = scmp.ge.s32.totalorder %s572_s12, 1 }
   0x9   : > { %p626_p4 = por %p869_p1, %p39_p0  ;;  %p97_p7 = scmp.lt.s32.totalorder %s572_s12, 3 }
   0xa   : > { %p631_p6 = por %p90_p3, %p39_p0  ;;  %s574_s18 = smov [#allocation5]  }
   0xb   : > { %s872_s15 = scalar_select %p626_p4, 1, 0 }
   0xc   : > { %s873_s16 = scalar_select %p631_p6, 1, 0 }
   0xd   : > { %p636_p8 = pnand %p369_p5, %p97_p7  ;;  %s109_s19 = sshll.u32 %s574_s18, 4  ;;  %s640_s19 = int_to_ptr.vmem [resolvable:$true] %s109_s19 }
   0xe   : > { %s652_s21 = sadd.s32 1, %s572_s12   ;;  %s26_s22 = sadd.s32 1, %s568_s11 }
   0xf   : > { %s874_s17 = scalar_select %p636_p8, 1, 0 }
  0x10   : > { %p391_p9 = pneg %p636_p8  ;;  %s23_s23 = ssub.s32 %s572_s12, %s652_s21 }
  0x11   : > { %s444_s26 = scalar_lea.hbm %s867_s1, 1536 }
  0x12   : > { %p647_p11 = pnand %p391_p9, %p869_p1  ;;  %p445_p12 = scmp.ne.s32.totalorder %s867_s1, %s444_s26 }
  0x13   : > { %p451_p5 = scmp.lt.u32.totalorder %s444_s26, %s867_s1 }
  0x14   : > { %p446_p13 = pneg %p647_p11 }
  0x16   : > { %p447_p0 = pnand %p446_p13, %p445_p12 }
  0x18   : > { %p448_p3 = pneg %p447_p0 }
  0x1a   : > { %p453_p7 = pnand %p451_p5, %p448_p3 }
  0x1c   : > { %456 = shalt.err (!%p453_p7)
}
  0x1d   : > { %s457_s3 = scalar_lea.vmem %s640_s19, 1536  ;;  %p465_p2 = scmp.lt.s32.totalorder %s640_s19, %s640_s19 }
  0x1e   : > { %p458_p9 = scmp.ne.s32.totalorder %s640_s19, %s457_s3  ;;  %p466_p6 = scmp.lt.s32.totalorder %s457_s3, %s457_s3 }
  0x20   : > { %p460_p10 = pnand %p458_p9, %p446_p13  ;;  %p467_p4 = por %p466_p6, %p465_p2 }
  0x22   : > { %p461_p1 = pneg %p460_p10 }
  0x24   : > { %p468_p8 = pnand %p467_p4, %p461_p1 }
  0x26   : > { %471 = shalt.err (!%p468_p8)
}
  0x27   : > { %s575_s4 = smov 128   ;;  %s576_s5 = smov 8  }
  0x28   : > { %394 = dma.hbm_to_vmem [thread:$0]  (!%p647_p11), %s867_s1, 1536, %s640_s19, [#allocation6], %s575_s4, %s575_s4, %s576_s5  }
  0x29   : > { %p24_p1 = scmp.eq.s32.totalorder %s23_s23, 0  ;;  %p33_p2 = scmp.ne.s32.totalorder %s568_s11, %s564_s10 }
  0x2a   : > { %p34_p4 = scmp.eq.s32.totalorder %s572_s12, 0  ;;  %p404_p6 = scmp.lt.s32.totalorder %s572_s12, 2 }
  0x2b   : > { %s686_s8 = scalar_select %p24_p1, %s568_s11, %s26_s22  }
  0x2c   : > { %p35_p8 = por %p34_p4, %p33_p2  ;;  %p876_p10 = scmp.eq.s32.totalorder %s617_s13, 1 }
  0x2d   : > { %s123_s18 = sand.u32 1, %s568_s11   ;;  %s379_s20 = smul.u32 768, %s572_s12 }
  0x2e   : > { %p690_p12 = por %p876_p10, %p33_p2  ;;  %s378_s24 = smul.u32 48, %s123_s18 }
  0x2f   : > { %p696_p13 = pnand %p404_p6, %p35_p8  ;;  %s703_s22 = scalar_lea.hbm %s866_s0, %s379_s20 }
  0x30   : > { %s127_s26 = scalar_lea.vmem [#allocation2], %s378_s24  ;;  %s707_s28 = scalar_lea.sflag [#allocation3], %s123_s18 }
  0x31   : > { %s134_s27 = sshll.u32 %s127_s26, 4  ;;  %s472_s29 = scalar_lea.hbm %s703_s22, 768  ;;  %s705_s27 = int_to_ptr.vmem [resolvable:$true] %s134_s27 }
  0x32   : > { %p473_p11 = scmp.ne.s32.totalorder %s703_s22, %s472_s29  ;;  %p474_p0 = pneg %p696_p13 }
  0x33   : > { %s477_s6 = scalar_lea.hbm %s866_s0, 1536  ;;  %p478_p7 = scmp.lt.u32.totalorder %s703_s22, %s866_s0 }
  0x34   : > { %p475_p3 = pnand %p474_p0, %p473_p11  ;;  %p479_p9 = scmp.lt.u32.totalorder %s477_s6, %s472_s29 }
  0x35   : > { %p481_p2 = scmp.lt.u32.totalorder %s472_s29, %s703_s22 }
  0x36   : > { %p476_p5 = pneg %p475_p3  ;;  %p480_p1 = por %p479_p9, %p478_p7 }
  0x38   : > { %p482_p4 = por %p481_p2, %p480_p1 }
  0x3a   : > { %p483_p6 = pnand %p482_p4, %p476_p5 }
  0x3c   : > { %486 = shalt.err (!%p483_p6)
}
  0x3d   : > { %s487_s18 = scalar_lea.vmem %s705_s27, 768  ;;  %s577_s24 = smov [#allocation2]  }
  0x3e   : > { %p488_p8 = scmp.ne.s32.totalorder %s705_s27, %s487_s18  ;;  %s492_s19 = sshll.u32 %s577_s24, 4  ;;  %s493_s19 = int_to_ptr.vmem [resolvable:$false] %s492_s19 }
  0x3f   : > { %s494_s23 = scalar_lea.vmem %s493_s19, 1536  ;;  %p495_p3 = scmp.lt.s32.totalorder %s705_s27, %s493_s19 }
  0x40   : > { %p490_p10 = pnand %p488_p8, %p474_p0  ;;  %p496_p7 = scmp.lt.s32.totalorder %s494_s23, %s487_s18 }
  0x42   : > { %p491_p11 = pneg %p490_p10  ;;  %p497_p9 = por %p496_p7, %p495_p3 }
  0x44   : > { %p498_p1 = pnand %p497_p9, %p491_p11 }
  0x46   : > { %501 = shalt.err (!%p498_p1)
}
  0x47   : > { %398 = dma.hbm_to_vmem [thread:$0]  (!%p696_p13), %s703_s22, 768, %s705_s27, %s707_s28, %s575_s4, %s575_s4, %s576_s5  }
  0x48   : > { %p879_p0 = scmp.ne.s32.totalorder %s874_s17, 0 }
  0x49   : > { %s741_s26 = sand.u32 (!%p879_p0), 1, %s564_s10   ;;  %p880_p5 = scmp.ne.s32.totalorder (!%p879_p0), %s872_s15, 0 }
  0x4a   : > { %146 = sbr.rel (%p879_p0) target bundleno = 231 (0xe7), region = 28  ;;  %s149_s30 = scalar_lea.sflag (!%p879_p0), [#allocation3], %s741_s26 }
  0x4b   : > { %s380_s29 = smul.u32 (!%p879_p0), 48, %s741_s26 }
  0x4d   : > { %s152_s3 = scalar_lea.vmem (!%p879_p0), [#allocation2], %s380_s29 }
  0x51   : > { %547 = dma.done.wait (%p880_p5), %s149_s30, 768  }
  0x52   : > { %549 = vsyncadd (%p880_p5), %s149_s30, 4294966528  ;;  %p881_p2 = scmp.eq.s32.totalorder %s617_s13, 0 }
  0x54   : > { %551 = dma.done.wait (%p881_p2), [#allocation6], 1536   ;;  %p882_p13 = pmov %p881_p2 }
  0x55   : > { %s381_s17 = smul.u32 96, %s741_s26  ;;  %v192_v0 = vld [vmem:[%s152_s3 + $0x10] sm:$0xff]  ;;  %v190_v1 = vld [vmem:[%s152_s3] sm:$0xff]  ;;  %v193_v2 = vld [vmem:[%s152_s3 + $0x18] sm:$0xff]  ;;  %vm180_vm0 = vcmask 261120   ;;  %s578_s4 = smov 8   ;;  %v246_v24 = vlaneseq }
  0x56   : > { %553 = vsyncadd (%p882_p13), [#allocation6], 4294965760  ;;  %v198_v3 = vmax.f32 %v192_v0, 0.0  ;;  %v196_v4 = vmax.f32 %v190_v1, 0.0  ;;  %v199_v5 = vmax.f32 %v193_v2, 0.0  ;;  %v191_v6 = vld [vmem:[%s152_s3 + $0x8] sm:$0xff] }
  0x57   : > { %v195_v7 = vld [vmem:[%s152_s3 + $0x28] sm:$0xff]  ;;  %v197_v8 = vmax.f32 %v191_v6, 0.0  ;;  %v194_v9 = vld [vmem:[%s152_s3 + $0x20] sm:$0xff]  ;;  %s754_s15 = scalar_lea.vmem [#allocation7], %s381_s17  ;;  %v247_v25 = vand.u32 127, %v246_v24  ;;  %vm232_vm3 = vcmask 64512  }
  0x58   : > { %v177_v10 = vld [vmem:[#allocation5] sm:$0xff]  ;;  %v204_v12 = vmin.f32 %v198_v3, 1.0  ;;  %v202_v13 = vmin.f32 %v196_v4, 1.0  ;;  %v184_v15 = vld [vmem:[#allocation5 + $0x18] sm:$0xff]  ;;  %v205_v18 = vmin.f32 %v199_v5, 1.0  ;;  %v201_v20 = vmax.f32 %v195_v7, 0.0 }
  0x59   : > { %v178_v11 = vld [vmem:[#allocation5 + $0x20] sm:$0xff]  ;;  %181 = vst.msk [vmem:[%s754_s15] sm:$0xff] %vm180_vm0, %v177_v10  ;;  %v185_v16 = vld [vmem:[#allocation5 + $0x38] sm:$0xff]  ;;  %187 = vst.msk [vmem:[%s754_s15 + $0x18] sm:$0xff] %vm180_vm0, %v184_v15  ;;  %v203_v19 = vmin.f32 %v197_v8, 1.0  ;;  %v200_v21 = vmax.f32 %v194_v9, 0.0 }
  0x5a   : > { %v179_v14 = vld [vmem:[#allocation5 + $0x40] sm:$0xff]  ;;  %182 = vst.msk [vmem:[%s754_s15 + $0x20] sm:$0xff] %vm180_vm0, %v178_v11  ;;  %v186_v17 = vld [vmem:[#allocation5 + $0x58] sm:$0xff]  ;;  %188 = vst.msk [vmem:[%s754_s15 + $0x38] sm:$0xff] %vm180_vm0, %v185_v16  ;;  %218 = vrot.lane.b32.xlu1 %v204_v12, %s578_s4  ;;  %214 = vrot.lane.b32.xlu0 %v202_v13, %s578_s4  ;;  %v207_v22 = vmin.f32 %v201_v20, 1.0  ;;  %vm248_vm1 = vcmp.ge.s32.totalorder %v247_v25, 8 }
  0x5b   : > { %183 = vst.msk [vmem:[%s754_s15 + $0x40] sm:$0xff] %vm180_vm0, %v179_v14  ;;  %189 = vst.msk [vmem:[%s754_s15 + $0x58] sm:$0xff] %vm180_vm0, %v186_v17  ;;  %v206_v23 = vmin.f32 %v200_v21, 1.0  ;;  %vm249_vm2 = vcmp.lt.s32.totalorder %v247_v25, 24  ;;  %vm239_vm4 = vcmask 195584   ;;  %v253_v27 = vld [vmem:[#allocation5 + $0x28] sm:$0xff] }
  0x5c   : > { %vm774_vm5 = vmand %vm248_vm1, %vm249_vm2  ;;  %v251_v29 = vld [vmem:[#allocation5 + $0x8] sm:$0xff]  ;;  %v254_v37 = vld [vmem:[#allocation5 + $0x30] sm:$0xff]  ;;  %s382_s5 = smul.u32 1536, %s617_s13  ;;  %s285_s25 = sshll.u32 %s754_s15, 4  ;;  %s813_s25 = int_to_ptr.vmem [resolvable:$true] %s285_s25 }
  0x5d   : > { %v252_v39 = vld [vmem:[#allocation5 + $0x10] sm:$0xff]  ;;  %v255_v49 = vld [vmem:[#allocation5 + $0x48] sm:$0xff]  ;;  %s272_s28 = scalar_lea.sflag [#allocation4], %s741_s26  ;;  %s502_s6 = scalar_lea.vmem %s813_s25, 1536 }
  0x5e   : > { %220 = vrot.lane.b32.xlu1 %v205_v18, %s578_s4  ;;  %216 = vrot.lane.b32.xlu0 %v203_v19, %s578_s4  ;;  %v256_v47 = vld [vmem:[#allocation5 + $0x50] sm:$0xff]  ;;  %s811_s27 = scalar_lea.hbm %s868_s2, %s382_s5  ;;  %p503_p4 = scmp.ne.s32.totalorder %s813_s25, %s502_s6 }
  0x5f   : > { %s579_s7 = smov [#allocation7]  }
  0x60   : > { %p504_p6 = pnand %p503_p4, %p690_p12  ;;  %s506_s20 = sshll.u32 %s579_s7, 4  ;;  %s507_s20 = int_to_ptr.vmem [resolvable:$false] %s506_s20 }
  0x61   : > { %s508_s18 = scalar_lea.vmem %s507_s20, 3072  ;;  %p509_p10 = scmp.lt.s32.totalorder %s813_s25, %s507_s20 }
  0x62   : > { %224 = vrot.lane.b32.xlu1 %v207_v22, %s578_s4  ;;  %222 = vrot.lane.b32.xlu0 %v206_v23, %s578_s4  ;;  %p505_p8 = pneg %p504_p6  ;;  %p510_p11 = scmp.lt.s32.totalorder %s508_s18, %s502_s6 }
  0x64   : > { %p511_p3 = por %p510_p11, %p509_p10 }
  0x66   : > { %p512_p7 = pnand %p511_p3, %p505_p8 }
  0xcc   : > { %v219_v28 = vpop.permute.xlu1 %218  ;;  %v215_v30 = vpop.permute.xlu0 %214 }
  0xcd   : > { %v235_v31 = vsel %vm232_vm3, 0.0, %v219_v28  ;;  %v233_v32 = vsel %vm232_vm3, 0.0, %v215_v30 }
  0xce   : > { %v242_v33 = vsel %vm239_vm4, %v235_v31, 0.0  ;;  %v240_v34 = vsel %vm239_vm4, %v233_v32, 0.0 }
  0xcf   : > { %v261_v35 = vsel %vm774_vm5, %v242_v33, %v253_v27  ;;  %v259_v36 = vsel %vm774_vm5, %v240_v34, %v251_v29 }
  0xd0   : > { %267 = vst.msk [vmem:[%s754_s15 + $0x28] sm:$0xff] %vm180_vm0, %v261_v35  ;;  %265 = vst.msk [vmem:[%s754_s15 + $0x8] sm:$0xff] %vm180_vm0, %v259_v36  ;;  %v221_v38 = vpop.permute.xlu1 %220  ;;  %v217_v40 = vpop.permute.xlu0 %216 }
  0xd1   : > { %v236_v41 = vsel %vm232_vm3, 0.0, %v221_v38  ;;  %v234_v42 = vsel %vm232_vm3, 0.0, %v217_v40 }
  0xd2   : > { %v243_v43 = vsel %vm239_vm4, %v236_v41, 0.0  ;;  %v241_v44 = vsel %vm239_vm4, %v234_v42, 0.0 }
  0xd3   : > { %v262_v45 = vsel %vm774_vm5, %v243_v43, %v254_v37  ;;  %v260_v46 = vsel %vm774_vm5, %v241_v44, %v252_v39 }
  0xd4   : > { %268 = vst.msk [vmem:[%s754_s15 + $0x30] sm:$0xff] %vm180_vm0, %v262_v45  ;;  %266 = vst.msk [vmem:[%s754_s15 + $0x10] sm:$0xff] %vm180_vm0, %v260_v46  ;;  %v225_v48 = vpop.permute.xlu1 %224  ;;  %v223_v50 = vpop.permute.xlu0 %222 }
  0xd5   : > { %v238_v51 = vsel %vm232_vm3, 0.0, %v225_v48  ;;  %v237_v52 = vsel %vm232_vm3, 0.0, %v223_v50 }
  0xd6   : > { %v245_v53 = vsel %vm239_vm4, %v238_v51, 0.0  ;;  %v244_v54 = vsel %vm239_vm4, %v237_v52, 0.0 }
  0xd7   : > { %v264_v55 = vsel %vm774_vm5, %v245_v53, %v256_v47  ;;  %v263_v56 = vsel %vm774_vm5, %v244_v54, %v255_v49 }
  0xd8   : > { %270 = vst.msk [vmem:[%s754_s15 + $0x50] sm:$0xff] %vm180_vm0, %v264_v55  ;;  %269 = vst.msk [vmem:[%s754_s15 + $0x48] sm:$0xff] %vm180_vm0, %v263_v56 }
  0xd9   : > { %515 = shalt.err (!%p512_p7)
}
  0xda   : > { %s516_s24 = scalar_lea.hbm %s811_s27, 1536  ;;  %s520_s29 = scalar_lea.hbm %s868_s2, 3072 }
  0xdb   : > { %p517_p9 = scmp.ne.s32.totalorder %s811_s27, %s516_s24  ;;  %p521_p5 = scmp.lt.u32.totalorder %s811_s27, %s868_s2 }
  0xdc   : > { %p522_p2 = scmp.lt.u32.totalorder %s520_s29, %s516_s24  ;;  %p524_p4 = scmp.lt.u32.totalorder %s516_s24, %s811_s27 }
  0xdd   : > { %p518_p1 = pnand %p517_p9, %p690_p12 }
  0xde   : > { %p523_p13 = por %p522_p2, %p521_p5 }
  0xdf   : > { %p519_p0 = pneg %p518_p1 }
  0xe0   : > { %p525_p6 = por %p524_p4, %p523_p13 }
  0xe2   : > { %p526_p8 = pnand %p525_p6, %p519_p0 }
  0xe4   : > { %529 = shalt.err (!%p526_p8)
}
  0xe5   : > { %s580_s17 = smov 128  }
  0xe6   : > { %389 = dma.vmem_to_hbm [thread:$0]  (%p690_p12), %s813_s25, 1536, %s811_s27, %s272_s28, %s580_s17, %s580_s17, %s578_s4  }
  0xe7 PF: > { %s300_s15 = sand.u32 1, %s560_s9   ;;  %p885_p10 = scmp.ne.s32.totalorder %s873_s16, 0 }
  0xe8   : > { %p886_p11 = scmp.ge.s32.totalorder %s572_s12, 2  ;;  %s301_s5 = scalar_lea.sflag [#allocation4], %s300_s15 }
  0xea   : > { %p400_p3 = pnand %p886_p11, %p885_p10 }
  0xec   : > { %555 = dma.done.wait (!%p400_p3), %s301_s5, 1536  }
  0xed   : > { %557 = vsyncadd (!%p400_p3), %s301_s5, 4294965760  ;;  %p16_p7 = scmp.ge.s32.totalorder %s652_s21, 4   ;;  %s887_s9 = smov %s564_s10 }
  0xee   : > { %s888_s10 = smov %s568_s11  ;;  %s889_s11 = smov %s686_s8 }
  0xef   : > { %s890_s12 = smov %s652_s21  ;;  %18 = sbr.rel (!%p16_p7) target bundleno = 6 (0x6), region = 77 }
  0xf6   :  { %306 = vsyncpa [#allocation3], 1 }
  0xf7   :  { %308 = vsyncpa [#allocation3 + $0x1], 1 }
  0xf8   :  { %309 = vsyncpa [#allocation6], 1 }
  0xf9   :  { %310 = vsyncpa [#allocation4], 1 }
  0xfa   :  { %312 = vsyncpa [#allocation4 + $0x1], 1 }

</bundles_post_ra>
